<compile_context>
chip_gen: v7x
topology: tpu7x:2x2x1
jax: 0.10.0
libtpu: 0.0.40
codegen_flags: <defaults>
</compile_context>

<pallas_src>
import functools

import jax
import jax.numpy as jnp
from jax.experimental import pallas as pl
from jax.experimental.pallas import tpu as pltpu

LN_EPS = 1e-6
QK_EPS = 1e-6


# --------------------------------------------------------------------------
# generation-specific defaults
# --------------------------------------------------------------------------
def _tpu_generation():
    try:
        kind = jax.devices()[0].device_kind.lower()
    except Exception:
        return 0
    for g in (7, 6, 5):
        if f"v{g}" in kind:
            return g
    return 0


_GEN = _tpu_generation()
_BIG_VMEM = _GEN in (5, 6)                       # v5e / v6e: 128 MiB physical VMEM
VMEM_LIMIT = (100 if _BIG_VMEM else 48) * 1024 * 1024
MM_TM = 1024 if _BIG_VMEM else 512               # GEMM tile targets
MM_TN = 2048 if _BIG_VMEM else 1024
MM_TK = 512
PROJ_TS = 1024 if _BIG_VMEM else 512             # proj_out row tile
LN_TS = 1024 if _BIG_VMEM else 512               # ln_modulate / k-rms row tile
EXP_BF16 = _GEN in (6, 7)                        # bf16 EUP exp (not on v5e); ~1e-3 rel err


# --------------------------------------------------------------------------
# helpers
# --------------------------------------------------------------------------
def _tile(dim, target, align):
    """Largest aligned divisor of `dim` that is <= target (falls back to full dim).
    TODO(synk): pad+mask instead of full-dim fallback for odd/prime dims (not hit here)."""
    if dim <= target:
        return dim
    t = (target // align) * align
    while t >= align:
        if dim % t == 0:
            return t
        t -= align
    return dim


# --------------------------------------------------------------------------
# kernels
# --------------------------------------------------------------------------
def _matmul_kernel(x_ref, w_ref, b_ref, o_ref, acc_ref, *, pre_act, post_act):
    # x: (tm, tk) bf16; w: (tk, tn) bf16 (pre-transposed (K,N)); b: (1, tn) f32
    @pl.when(pl.program_id(2) == 0)
    def _():
        acc_ref[...] = jnp.zeros(acc_ref.shape, acc_ref.dtype)

    x = x_ref[...]
    if pre_act == "silu":
        xf = x.astype(jnp.float32)
        x = (xf * jax.nn.sigmoid(xf)).astype(x.dtype)

    acc_ref[...] += jnp.dot(x, w_ref[...], preferred_element_type=jnp.float32)

    @pl.when(pl.program_id(2) == pl.num_programs(2) - 1)
    def _():
        y = acc_ref[...] + b_ref[...].astype(jnp.float32)
        if post_act == "gelu_tanh":
            y = jax.nn.gelu(y, approximate=True)          # GELU(approximate='tanh')
        o_ref[...] = y.astype(o_ref.dtype)


def _ln_modulate_kernel(x_ref, shift_ref, scale_ref, o_ref):
    # x: (1, ts, D) bf16; shift/scale: (1, 1, D) f32 -> LN(no affine)*(1+scale)+shift
    x = x_ref[0].astype(jnp.float32)
    mu = jnp.mean(x, axis=-1, keepdims=True)
    xc = x - mu
    var = jnp.mean(xc * xc, axis=-1, keepdims=True)
    xn = xc * jax.lax.rsqrt(var + LN_EPS)
    out = xn * (1.0 + scale_ref[0].astype(jnp.float32)) + shift_ref[0].astype(jnp.float32)
    o_ref[0] = out.astype(o_ref.dtype)


def _k_rmsnorm_kernel(k_ref, w_ref, o_ref):
    # pre-normalize the K stream once (RMSNorm over head_dim, per head)
    x = k_ref[0].astype(jnp.float32)
    xn = x * jax.lax.rsqrt(jnp.mean(x * x, axis=-1, keepdims=True) + QK_EPS)
    o_ref[0] = (xn * w_ref[...].astype(jnp.float32)).astype(o_ref.dtype)


def _flash_attn_kernel(q_ref, k_ref, v_ref, wq_ref, o_ref,
                       m_sc, l_sc, acc_sc, q_sc, *, scale, exp_bf16):
    # q (1, tq, Dh) raw, k (1, tkv, Dh) PRE-normalized, v (1, tkv, Dh), wq (1, Dh)
    ki = pl.program_id(3)

    @pl.when(ki == 0)
    def _():
        m_sc[...] = jnp.full(m_sc.shape, -jnp.inf, m_sc.dtype)
        l_sc[...] = jnp.zeros(l_sc.shape, l_sc.dtype)
        acc_sc[...] = jnp.zeros(acc_sc.shape, acc_sc.dtype)
        # q RMSNorm + softmax scale hoisted out of the kv loop (computed once
        # per q tile, reused for every kv step); scale folded into the weight.
        # TODO(synk): image_rotary_emb (default None in this forward) not applied.
        qf = q_ref[0].astype(jnp.float32)
        qn = qf * jax.lax.rsqrt(jnp.mean(qf * qf, axis=-1, keepdims=True) + QK_EPS)
        qn = qn * (wq_ref[...].astype(jnp.float32) * scale)
        q_sc[...] = qn.astype(q_sc.dtype)

    # q @ k^T via dimension_numbers (no materialized transpose)
    s = jax.lax.dot_general(q_sc[...], k_ref[0], (((1,), (1,)), ((), ())),
                            preferred_element_type=jnp.float32)           # (tq, tkv)

    m_prev = m_sc[...]
    m_new = jnp.maximum(m_prev, jnp.max(s, axis=-1, keepdims=True))
    alpha = jnp.exp(m_prev - m_new)
    if exp_bf16:
        # bf16 EUP exp (v6e/v7x): p is consumed in bf16 by the P@V matmul anyway.
        p = jnp.exp((s - m_new).astype(jnp.bfloat16))
        p_sum = jnp.sum(p.astype(jnp.float32), axis=-1, keepdims=True)
        pv = p
    else:
        p = jnp.exp(s - m_new)
        p_sum = jnp.sum(p, axis=-1, keepdims=True)
        pv = p.astype(v_ref.dtype)
    l_sc[...] = alpha * l_sc[...] + p_sum
    acc_sc[...] = alpha * acc_sc[...] + jnp.dot(pv, v_ref[0],
                                                preferred_element_type=jnp.float32)
    m_sc[...] = m_new

    @pl.when(ki == pl.num_programs(3) - 1)
    def _():
        inv_l = pl.reciprocal(l_sc[...], approx=True)
        o_ref[0] = (acc_sc[...] * inv_l).astype(o_ref.dtype)


def _proj_out_kernel(attn_ref, mlp_ref, wa_ref, wm_ref, b_ref, gate_ref, res_ref,
                     o_ref, acc_ref, *, balanced):
    # fused: residual + gate * (attn @ Wa + mlp @ Wm + b)  == proj_out(cat([attn, mlp]))
    k = pl.program_id(3)

    if balanced:
        # attn contraction split evenly across the same k axis as the mlp one
        @pl.when(k == 0)
        def _():
            acc_ref[...] = jnp.zeros(acc_ref.shape, acc_ref.dtype)

        acc_ref[...] += jnp.dot(attn_ref[0], wa_ref[...],
                                preferred_element_type=jnp.float32)
    else:
        @pl.when(k == 0)
        def _():
            acc_ref[...] = jnp.dot(attn_ref[0], wa_ref[...],
                                   preferred_element_type=jnp.float32)

    acc_ref[...] += jnp.dot(mlp_ref[0], wm_ref[...], preferred_element_type=jnp.float32)

    @pl.when(k == pl.num_programs(3) - 1)
    def _():
        y = acc_ref[...] + b_ref[...].astype(jnp.float32)
        y = res_ref[0].astype(jnp.float32) + gate_ref[0].astype(jnp.float32) * y
        o_ref[0] = y.astype(o_ref.dtype)


# --------------------------------------------------------------------------
# wrappers
# --------------------------------------------------------------------------
def pallas_matmul(x, w, b, *, pre_act=None, post_act=None, out_dtype=None,
                  tm_target=MM_TM, tn_target=MM_TN, tk_target=MM_TK):
    """x:(M,K) @ w:(K,N) + b with tiled grid, bf16 MXU inputs, f32 accumulation."""
    M, K = x.shape
    _, N = w.shape
    tm = _tile(M, tm_target, 16)          # bf16 native sublane tiling is 16
    tn = _tile(N, tn_target, 128)
    tk = _tile(K, tk_target, 128)
    grid = (M // tm, N // tn, K // tk)
    kernel = functools.partial(_matmul_kernel, pre_act=pre_act, post_act=post_act)
    return pl.pallas_call(
        kernel,
        out_shape=jax.ShapeDtypeStruct((M, N), out_dtype or x.dtype),
        grid=grid,
        in_specs=[
            pl.BlockSpec((tm, tk), lambda i, j, k: (i, k)),
            pl.BlockSpec((tk, tn), lambda i, j, k: (k, j)),
            pl.BlockSpec((1, tn), lambda i, j, k: (0, j)),
        ],
        out_specs=pl.BlockSpec((tm, tn), lambda i, j, k: (i, j)),
        scratch_shapes=[pltpu.VMEM((tm, tn), jnp.float32)],
        compiler_params=pltpu.CompilerParams(
            dimension_semantics=("parallel", "parallel", "arbitrary"),
            vmem_limit_bytes=VMEM_LIMIT),
    )(x, w, b)


def pallas_ln_modulate(x, shift, scale, *, out_dtype, ts_target=LN_TS):
    B, S, D = x.shape
    ts = _tile(S, ts_target, 16)
    return pl.pallas_call(
        _ln_modulate_kernel,
        out_shape=jax.ShapeDtypeStruct((B, S, D), out_dtype),
        grid=(B, S // ts),
        in_specs=[
            pl.BlockSpec((1, ts, D), lambda b, s: (b, s, 0)),
            pl.BlockSpec((1, 1, D), lambda b, s: (b, 0, 0)),
            pl.BlockSpec((1, 1, D), lambda b, s: (b, 0, 0)),
        ],
        out_specs=pl.BlockSpec((1, ts, D), lambda b, s: (b, s, 0)),
        compiler_params=pltpu.CompilerParams(
            dimension_semantics=("parallel", "parallel"),
            vmem_limit_bytes=VMEM_LIMIT),
    )(x, shift, scale)


def pallas_k_rmsnorm(qkv, rms_k_w, H, Dh, *, ts_target=LN_TS):
    """Pre-normalize the K columns of the merged qkv tensor once (per-head RMSNorm)."""
    B, S, _ = qkv.shape
    ts = _tile(S, ts_target, 16)
    return pl.pallas_call(
        _k_rmsnorm_kernel,
        out_shape=jax.ShapeDtypeStruct((B, S, H * Dh), qkv.dtype),
        grid=(B, H, S // ts),
        in_specs=[
            pl.BlockSpec((1, ts, Dh), lambda b, h, s: (b, s, H + h)),   # K columns of qkv
            pl.BlockSpec((1, Dh), lambda b, h, s: (0, 0)),
        ],
        out_specs=pl.BlockSpec((1, ts, Dh), lambda b, h, s: (b, s, h)),
        compiler_params=pltpu.CompilerParams(
            dimension_semantics=("parallel", "parallel", "parallel"),
            vmem_limit_bytes=VMEM_LIMIT),
    )(qkv, rms_k_w)


def pallas_flash_attention(qkv, k_norm, rms_q_w, H, Dh, *,
                           tq_target=256, tkv_target=512):
    """qkv: (B, S, 3*H*Dh) bf16 in [q|k|v] column order; k_norm: (B, S, H*Dh)
    pre-normalized K. Returns (B, S, H*Dh)."""
    B, S, _ = qkv.shape
    assert Dh % 128 == 0, "head_dim must be lane-aligned (Flux uses 128)"
    tq = _tile(S, tq_target, 16)
    tkv = _tile(S, tkv_target, 128)
    grid = (B, H, S // tq, S // tkv)
    kernel = functools.partial(_flash_attn_kernel, scale=1.0 / (Dh ** 0.5),
                               exp_bf16=EXP_BF16)
    return pl.pallas_call(
        kernel,
        out_shape=jax.ShapeDtypeStruct((B, S, H * Dh), qkv.dtype),
        grid=grid,
        in_specs=[
            pl.BlockSpec((1, tq, Dh), lambda b, h, qi, ki: (b, qi, h)),          # q
            pl.BlockSpec((1, tkv, Dh), lambda b, h, qi, ki: (b, ki, h)),         # k (normed)
            pl.BlockSpec((1, tkv, Dh), lambda b, h, qi, ki: (b, ki, 2 * H + h)), # v
            pl.BlockSpec((1, Dh), lambda b, h, qi, ki: (0, 0)),                  # rms_q_w
        ],
        out_specs=pl.BlockSpec((1, tq, Dh), lambda b, h, qi, ki: (b, qi, h)),
        scratch_shapes=[
            pltpu.VMEM((tq, 1), jnp.float32),        # running max
            pltpu.VMEM((tq, 1), jnp.float32),        # running denom
            pltpu.VMEM((tq, Dh), jnp.float32),       # output accumulator
            pltpu.VMEM((tq, Dh), jnp.bfloat16),      # normalized+scaled q (hoisted)
        ],
        compiler_params=pltpu.CompilerParams(
            dimension_semantics=("parallel", "parallel", "parallel", "arbitrary"),
            vmem_limit_bytes=VMEM_LIMIT),
    )(qkv, k_norm, qkv, rms_q_w)


def pallas_proj_out_fused(attn, mlp_h, wa, wm, b, gate, residual, *, out_dtype,
                          ts_target=PROJ_TS, tn_target=1024, tk_target=MM_TK):
    """residual + gate * (attn @ Wa + mlp_h @ Wm + b); gate: (B,1,N)."""
    B, S, Da = attn.shape
    Dm = mlp_h.shape[-1]
    N = wa.shape[1]
    ts = _tile(S, ts_target, 16)
    tn = _tile(N, tn_target, 128)
    tk = _tile(Dm, tk_target, 128)
    nk = Dm // tk
    # Balance the reduction axis: split attn@Wa across the same nk steps.
    tka = Da // nk if (Da % nk == 0) else 0
    balanced = tka > 0 and tka % 128 == 0
    if balanced:
        attn_spec = pl.BlockSpec((1, ts, tka), lambda b_, s, j, k: (b_, s, k))
        wa_spec = pl.BlockSpec((tka, tn), lambda b_, s, j, k: (k, j))
    else:
        attn_spec = pl.BlockSpec((1, ts, Da), lambda b_, s, j, k: (b_, s, 0))
        wa_spec = pl.BlockSpec((Da, tn), lambda b_, s, j, k: (0, j))
    grid = (B, S // ts, N // tn, nk)
    kernel = functools.partial(_proj_out_kernel, balanced=balanced)
    return pl.pallas_call(
        kernel,
        out_shape=jax.ShapeDtypeStruct((B, S, N), out_dtype),
        grid=grid,
        in_specs=[
            attn_spec,
            pl.BlockSpec((1, ts, tk), lambda b_, s, j, k: (b_, s, k)),
            wa_spec,
            pl.BlockSpec((tk, tn), lambda b_, s, j, k: (k, j)),
            pl.BlockSpec((1, tn), lambda b_, s, j, k: (0, j)),
            pl.BlockSpec((1, 1, tn), lambda b_, s, j, k: (b_, 0, j)),
            pl.BlockSpec((1, ts, tn), lambda b_, s, j, k: (b_, s, j)),
        ],
        out_specs=pl.BlockSpec((1, ts, tn), lambda b_, s, j, k: (b_, s, j)),
        scratch_shapes=[pltpu.VMEM((ts, tn), jnp.float32)],
        compiler_params=pltpu.CompilerParams(
            dimension_semantics=("parallel", "parallel", "parallel", "arbitrary"),
            vmem_limit_bytes=VMEM_LIMIT),
    )(attn, mlp_h, wa, wm, b, gate, residual)


# --------------------------------------------------------------------------
# FluxSingleTransformerBlock forward
# --------------------------------------------------------------------------
def flux_single_transformer_block(params, hidden_states, encoder_hidden_states, temb):
    B, S_img, D = hidden_states.shape
    S_txt = encoder_hidden_states.shape[1]
    S = S_txt + S_img
    H, Dh = params["heads"], params["head_dim"]
    in_dtype = hidden_states.dtype
    cdt = jnp.bfloat16                                   # MXU / activation dtype

    # hidden_states = cat([encoder_hidden_states, hidden_states], dim=1); residual kept.
    # NOTE(numerics): activations/residual are carried in bf16 (bandwidth win,
    # LN/softmax/accumulation math stays f32 in-kernel).
    hs = jnp.concatenate([encoder_hidden_states, hidden_states], axis=1).astype(cdt)
    residual = hs                                        # (B, S, D) bf16

    # AdaLayerNormZeroSingle: Linear(SiLU(temb)) -> shift, scale, gate
    # M = B (tiny) -> pure weight streaming: full-K, wide-N tiles kill grid overhead.
    mod = pallas_matmul(temb.astype(cdt), params["norm_w"], params["norm_b"],
                        pre_act="silu", out_dtype=jnp.float32,
                        tm_target=16, tn_target=2048,
                        tk_target=temb.shape[-1])                           # (B, 3D)
    shift = mod[:, :D].reshape(B, 1, D)
    scale = mod[:, D:2 * D].reshape(B, 1, D)
    gate = mod[:, 2 * D:].reshape(B, 1, D)

    # LayerNorm(no affine) * (1 + scale) + shift  (single fused elementwise kernel)
    norm_hs = pallas_ln_modulate(hs, shift, scale, out_dtype=cdt)           # (B, S, D) bf16
    x2 = norm_hs.reshape(B * S, D)

    # fused q/k/v projection — one read of norm_hs, merged-head output layout
    qkv = pallas_matmul(x2, params["qkv_w"], params["qkv_b"],
                        out_dtype=cdt).reshape(B, S, 3 * H * Dh)

    # MLP branch: proj_mlp + GELU(tanh) fused in the matmul epilogue
    mlp_h = pallas_matmul(x2, params["mlp_w"], params["mlp_b"],
                          post_act="gelu_tanh", out_dtype=cdt).reshape(B, S, -1)

    # K RMSNorm done once (flash kernel would otherwise redo it per q-row block)
    k_norm = pallas_k_rmsnorm(qkv, params["rms_k_w"], H, Dh)                # (B, S, H*Dh)

    # flash attention: q-RMS + scale hoisted to ki==0, pre-normalized K, online softmax
    attn = pallas_flash_attention(qkv, k_norm, params["rms_q_w"], H, Dh)    # (B, S, D) bf16

    # residual + gate * proj_out(cat([attn, mlp_h])) — concat never materialized,
    # attn/mlp contractions balanced over one reduction axis.
    out = pallas_proj_out_fused(attn, mlp_h, params["out_w_attn"], params["out_w_mlp"],
                                params["out_b"], gate, residual, out_dtype=in_dtype)

    # TODO(synk): float16 clamp(-65504, 65504) branch not needed (bf16/f32 compute path).
    encoder_out = out[:, :S_txt]
    hidden_out = out[:, S_txt:]
    return encoder_out, hidden_out


# --------------------------------------------------------------------------
# deterministic parameter init (kernel-friendly layouts: torch weight.T, bf16)
# --------------------------------------------------------------------------
def init_params(key, dim, heads, head_dim, mlp_ratio=4.0):
    inner = heads * head_dim                  # == dim (Flux convention, out_dim=dim)
    mlp_dim = int(dim * mlp_ratio)
    wdt = jnp.bfloat16

    def dense(k, in_f, out_f):
        kw, kb = jax.random.split(k)
        w = (jax.random.normal(kw, (in_f, out_f), jnp.float32) * 0.02).astype(wdt)
        b = jax.random.normal(kb, (1, out_f), jnp.float32) * 0.01
        return w, b

    keys = jax.random.split(key, 5)
    p = {"heads": heads, "head_dim": head_dim}
    # AdaLayerNormZeroSingle.linear : dim -> 3*dim
    p["norm_w"], p["norm_b"] = dense(keys[0], dim, 3 * dim)
    # fused [to_q | to_k | to_v] : dim -> 3*inner  (concat of torch weights, transposed)
    p["qkv_w"], p["qkv_b"] = dense(keys[1], dim, 3 * inner)
    # proj_mlp : dim -> 4*dim
    p["mlp_w"], p["mlp_b"] = dense(keys[2], dim, mlp_dim)
    # proj_out : (dim + 4*dim) -> dim, stored transposed and split into attn/mlp row blocks
    p["out_w_attn"], p["out_b"] = dense(keys[3], inner, dim)
    p["out_w_mlp"], _ = dense(keys[4], mlp_dim, dim)
    # RMSNorm weights initialise to ones (diffusers RMSNorm default)
    p["rms_q_w"] = jnp.ones((1, head_dim), jnp.float32)
    p["rms_k_w"] = jnp.ones((1, head_dim), jnp.float32)
    return p


if __name__ == "__main__":
    B, S_txt, S_img = 2, 8, 16
    heads, head_dim = 2, 128                  # Flux head_dim=128 keeps head slices lane-aligned
    dim = heads * head_dim                    # 256

    key = jax.random.PRNGKey(0)
    k_par, k_hid, k_enc, k_temb = jax.random.split(key, 4)

    params = init_params(k_par, dim, heads, head_dim)
    hidden_states = jax.random.normal(k_hid, (B, S_img, dim), jnp.float32)
    encoder_hidden_states = jax.random.normal(k_enc, (B, S_txt, dim), jnp.float32)
    temb = jax.random.normal(k_temb, (B, dim), jnp.float32)

    enc_out, hid_out = flux_single_transformer_block(
        params, hidden_states, encoder_hidden_states, temb)
    jax.block_until_ready((enc_out, hid_out))

    assert enc_out.shape == (B, S_txt, dim)
    assert hid_out.shape == (B, S_img, dim)
    assert bool(jnp.all(jnp.isfinite(enc_out))) and bool(jnp.all(jnp.isfinite(hid_out)))
    print("KERNEL_OK")
</pallas_src>

<mosaic_0001>
module attributes {stable_mosaic.version = 11 : i64} {
  func.func @_matmul_kernel(%arg0: i32, %arg1: i32, %arg2: i32, %arg3: memref<2x256xbf16, #tpu.memory_space<vmem>>, %arg4: memref<256x768xbf16, #tpu.memory_space<vmem>>, %arg5: memref<1x768xf32, #tpu.memory_space<vmem>>, %arg6: memref<2x768xf32, #tpu.memory_space<vmem>>, %arg7: memref<2x768xf32, #tpu.memory_space<vmem>>) attributes {dimension_semantics = [#tpu.dimension_semantics<parallel>, #tpu.dimension_semantics<parallel>, #tpu.dimension_semantics<arbitrary>], iteration_bounds = array<i64: 1, 1, 1>, scalar_prefetch = 0 : i64, scratch_operands = 1 : i64, tpu.core_type = #tpu.core_type<tc>, window_params = [{transform_indices = @transform_0, window_bounds = array<i64: 2, 256>}, {transform_indices = @transform_1, window_bounds = array<i64: 256, 768>}, {transform_indices = @transform_2, window_bounds = array<i64: 1, 768>}, {transform_indices = @transform_3, window_bounds = array<i64: 2, 768>}]} {
    %c0_i32 = arith.constant 0 : i32
    %0 = arith.cmpi eq, %arg2, %c0_i32 : i32
    %1 = arith.extui %0 : i1 to i32
    %c0_i32_0 = arith.constant 0 : i32
    %2 = arith.cmpi ne, %1, %c0_i32_0 : i32
    scf.if %2 {
      %cst_11 = arith.constant 0.000000e+00 : f32
      %20 = vector.broadcast %cst_11 : f32 to vector<2x768xf32>
      %c0_12 = arith.constant 0 : index
      %c0_13 = arith.constant 0 : index
      %21 = vector.load %arg7[%c0_12, %c0_13] : memref<2x768xf32, #tpu.memory_space<vmem>>, vector<2x768xf32>
      tpu.vector_store %arg7[%c0_12, %c0_13], %20 {strides = array<i32>} : memref<2x768xf32, #tpu.memory_space<vmem>>, vector<2x768xf32>,
    } else {
    }
    %c0 = arith.constant 0 : index
    %c0_1 = arith.constant 0 : index
    %3 = vector.load %arg3[%c0, %c0_1] : memref<2x256xbf16, #tpu.memory_space<vmem>>, vector<2x256xbf16>
    %4 = arith.extf %3 : vector<2x256xbf16> to vector<2x256xf32>
    %5 = arith.negf %4 : vector<2x256xf32>
    %6 = math.exp %5 : vector<2x256xf32>
    %cst = arith.constant 1.000000e+00 : f32
    %7 = vector.broadcast %cst : f32 to vector<2x256xf32>
    %8 = arith.addf %7, %6 : vector<2x256xf32>
    %9 = arith.divf %7, %8 : vector<2x256xf32>
    %10 = arith.mulf %4, %9 : vector<2x256xf32>
    %11 = arith.truncf %10 : vector<2x256xf32> to vector<2x256xbf16>
    %c0_2 = arith.constant 0 : index
    %c0_3 = arith.constant 0 : index
    %12 = vector.load %arg7[%c0_2, %c0_3] : memref<2x768xf32, #tpu.memory_space<vmem>>, vector<2x768xf32>
    %c0_4 = arith.constant 0 : index
    %c0_5 = arith.constant 0 : index
    %13 = vector.load %arg4[%c0_4, %c0_5] : memref<256x768xbf16, #tpu.memory_space<vmem>>, vector<256x768xbf16>
    %cst_6 = arith.constant dense<0.000000e+00> : vector<2x768xf32>
    %14 = tpu.matmul %11, %13, %cst_6 {dimension_numbers = #tpu.dot_dimension_numbers<[1], [0], [0], [1], [0, 0, 1, 1], [], []>} : vector<2x256xbf16>, vector<256x768xbf16>, vector<2x768xf32> -> vector<2x768xf32>
    %15 = arith.addf %12, %14 : vector<2x768xf32>
    %c0_7 = arith.constant 0 : index
    %c0_8 = arith.constant 0 : index
    %16 = vector.load %arg7[%c0_7, %c0_8] : memref<2x768xf32, #tpu.memory_space<vmem>>, vector<2x768xf32>
    tpu.vector_store %arg7[%c0_7, %c0_8], %15 {strides = array<i32>} : memref<2x768xf32, #tpu.memory_space<vmem>>, vector<2x768xf32>,
    %c0_i32_9 = arith.constant 0 : i32
    %17 = arith.cmpi eq, %arg2, %c0_i32_9 : i32
    %18 = arith.extui %17 : i1 to i32
    %c0_i32_10 = arith.constant 0 : i32
    %19 = arith.cmpi ne, %18, %c0_i32_10 : i32
    scf.if %19 {
      %c0_11 = arith.constant 0 : index
      %c0_12 = arith.constant 0 : index
      %20 = vector.load %arg7[%c0_11, %c0_12] : memref<2x768xf32, #tpu.memory_space<vmem>>, vector<2x768xf32>
      %c0_13 = arith.constant 0 : index
      %c0_14 = arith.constant 0 : index
      %21 = vector.load %arg5[%c0_13, %c0_14] : memref<1x768xf32, #tpu.memory_space<vmem>>, vector<1x768xf32>
      %22 = vector.broadcast %21 : vector<1x768xf32> to vector<2x768xf32>
      %23 = arith.addf %20, %22 : vector<2x768xf32>
      %c0_15 = arith.constant 0 : index
      %c0_16 = arith.constant 0 : index
      %24 = vector.load %arg6[%c0_15, %c0_16] : memref<2x768xf32, #tpu.memory_space<vmem>>, vector<2x768xf32>
      tpu.vector_store %arg6[%c0_15, %c0_16], %23 {strides = array<i32>} : memref<2x768xf32, #tpu.memory_space<vmem>>, vector<2x768xf32>,
    } else {
    }
    return
  }
  func.func @transform_0(%arg0: i32, %arg1: i32, %arg2: i32) -> (i32, i32) {
    %c0_i32 = arith.constant 0 : i32
    return %arg0, %arg2 : i32, i32
  }
  func.func @transform_1(%arg0: i32, %arg1: i32, %arg2: i32) -> (i32, i32) {
    %c0_i32 = arith.constant 0 : i32
    return %arg2, %arg1 : i32, i32
  }
  func.func @transform_2(%arg0: i32, %arg1: i32, %arg2: i32) -> (i32, i32) {
    %c0_i32 = arith.constant 0 : i32
    %c0_i32_0 = arith.constant 0 : i32
    return %c0_i32, %arg1 : i32, i32
  }
  func.func @transform_3(%arg0: i32, %arg1: i32, %arg2: i32) -> (i32, i32) {
    %c0_i32 = arith.constant 0 : i32
    return %arg0, %arg1 : i32, i32
  }
}

</mosaic_0001>

<bundles_post_ra>
// kernel: tpu_custom_call.1
= control target key start
LH: loop header
LB: loop body
LE: loop exit
PB: predicated region body
PF: predicated region fallthrough
CT: control target
= control target key end

     0   :  { %8 = vsyncpa [#allocation4], 0  ;;  %s1305_s0 = inlined_call_operand.hbm [shape: bf16[2,256], index: 0, kind: input, shape index: {}]   ;;  %s1306_s1 = inlined_call_operand.hbm [shape: bf16[256,768], index: 1, kind: input, shape index: {}]   ;;  %s1307_s2 = inlined_call_operand.vmem [shape: f32[1,768], index: 2, kind: input, shape index: {}]   ;;  %s1308_s3 = inlined_call_operand.hbm [shape: f32[2,768], index: 3, kind: output, shape index: {}]  }
   0x1   :  { %9 = vsyncpa [#allocation7], 0 }
   0x2   :  { %10 = vsyncpa [#allocation5], 0  ;;  %s1209_s12 = smov [#allocation3]   ;;  %s1210_s14 = smov [#allocation6]  }
   0x3   :  { %s17_s13 = sshll.u32 %s1209_s12, 4  ;;  %s26_s15 = sshll.u32 %s1210_s14, 4  ;;  %s18_s13 = int_to_ptr.vmem [resolvable:$true] %s17_s13  ;;  %s1236_s15 = int_to_ptr.vmem [resolvable:$true] %s26_s15 }
   0x4   :  { %s1137_s18 = scalar_lea.hbm %s1305_s0, 32 }
   0x5   :  { %p1138_p0 = scmp.ne.s32.totalorder %s1305_s0, %s1137_s18  ;;  %p1141_p1 = scmp.lt.u32.totalorder %s1137_s18, %s1305_s0 }
   0x7   :  { %p1143_p2 = pnand %p1141_p1, %p1138_p0 }
   0x9   :  { %1146 = shalt.err (!%p1143_p2)
}
   0xa   :  { %s1147_s23 = scalar_lea.vmem %s18_s13, 32  ;;  %p1152_p4 = scmp.lt.s32.totalorder %s18_s13, %s18_s13 }
   0xb   :  { %p1148_p3 = scmp.ne.s32.totalorder %s18_s13, %s1147_s23  ;;  %p1153_p5 = scmp.lt.s32.totalorder %s1147_s23, %s1147_s23 }
   0xd   :  { %p1154_p6 = por %p1153_p5, %p1152_p4 }
   0xf   :  { %p1155_p7 = pnand %p1154_p6, %p1148_p3 }
  0x11   :  { %1158 = shalt.err (!%p1155_p7)
}
  0x12   :  { %20 = dma.hbm_to_vmem [thread:$0]  %s1305_s0, 32, %s18_s13, [#allocation4]  }
  0x13   :  { %s1159_s28 = scalar_lea.hbm %s1306_s1, 12288 }
  0x14   :  { %p1160_p8 = scmp.ne.s32.totalorder %s1306_s1, %s1159_s28  ;;  %p1163_p9 = scmp.lt.u32.totalorder %s1159_s28, %s1306_s1 }
  0x16   :  { %p1165_p10 = pnand %p1163_p9, %p1160_p8 }
  0x18   :  { %1168 = shalt.err (!%p1165_p10)
}
  0x19   :  { %s1169_s6 = scalar_lea.vmem %s1236_s15, 12288  ;;  %p1174_p12 = scmp.lt.s32.totalorder %s1236_s15, %s1236_s15 }
  0x1a   :  { %p1170_p11 = scmp.ne.s32.totalorder %s1236_s15, %s1169_s6  ;;  %p1175_p13 = scmp.lt.s32.totalorder %s1169_s6, %s1169_s6 }
  0x1c   :  { %p1176_p0 = por %p1175_p13, %p1174_p12 }
  0x1e   :  { %p1177_p1 = pnand %p1176_p0, %p1170_p11 }
  0x20   :  { %1180 = shalt.err (!%p1177_p1)
}
  0x21   :  { %s1211_s0 = smov 384   ;;  %s1212_s7 = smov 24  }
  0x22   :  { %32 = dma.hbm_to_vmem [thread:$0]  %s1306_s1, 12288, %s1236_s15, [#allocation7], %s1211_s0, %s1211_s0, %s1212_s7  }
  0x23   :  { %1203 = dma.done.wait [#allocation4], 32  }
  0x24   :  { %1204 = vsyncadd [#allocation4], 4294967264 }
  0x25   :  { %1205 = dma.done.wait [#allocation7], 12288  }
  0x26   :  { %1206 = vsyncadd [#allocation7], 4294955008  ;;  %v989_v0 = vld [vmem:[#allocation6 + $0x4] ss:$24 sps:$4 sm:$0xff]   ;;  %v993_v2 = vld [vmem:[#allocation6] ss:$24 sps:$4 sm:$0xff]  }
  0x27   :  { %v991_v1 = vld [vmem:[#allocation6 + $0xc] ss:$24 sps:$4 sm:$0xff]   ;;  %647 = vmatprep.subr.bf16.mxu0 %v989_v0  ;;  %v994_v3 = vld [vmem:[#allocation6 + $0x8] ss:$24 sps:$4 sm:$0xff]   ;;  %v997_v5 = vld [vmem:[#allocation6 + $0x3c] ss:$24 sps:$4 sm:$0xff]  }
  0x28   :  { %688 = vmatprep.subr.bf16.mxu1 %v991_v1  ;;  %v995_v4 = vld [vmem:[#allocation6 + $0x34] ss:$24 sps:$4 sm:$0xff]   ;;  %648 = vmatpush1.bf16.msra.mxu0 %v993_v2  ;;  %v999_v6 = vld [vmem:[#allocation6 + $0x30] ss:$24 sps:$4 sm:$0xff]   ;;  %v1001_v8 = vld [vmem:[#allocation6 + $0x64] ss:$24 sps:$4 sm:$0xff]  }
  0x29   :  { %689 = vmatpush1.bf16.msra.mxu1 %v994_v3  ;;  %649 = vmatprep.subr.bf16.mxu0 %v995_v4  ;;  %v1000_v7 = vld [vmem:[#allocation6 + $0x38] ss:$24 sps:$4 sm:$0xff]   ;;  %v1003_v9 = vld [vmem:[#allocation6 + $0x6c] ss:$24 sps:$4 sm:$0xff]   ;;  %v1006_v11 = vld [vmem:[#allocation6 + $0x68] ss:$24 sps:$4 sm:$0xff]  }
  0x2a   :  { %690 = vmatprep.subr.bf16.mxu1 %v997_v5  ;;  %v1005_v10 = vld [vmem:[#allocation6 + $0x60] ss:$24 sps:$4 sm:$0xff]   ;;  %v1007_v12 = vld [vmem:[#allocation6 + $0x94] ss:$24 sps:$4 sm:$0xff]   ;;  %v1011_v14 = vld [vmem:[#allocation6 + $0x90] ss:$24 sps:$4 sm:$0xff]  }
  0x2b   :  { %v1009_v13 = vld [vmem:[#allocation6 + $0x9c] ss:$24 sps:$4 sm:$0xff]   ;;  %v1012_v15 = vld [vmem:[#allocation6 + $0x98] ss:$24 sps:$4 sm:$0xff]   ;;  %v1015_v17 = vld [vmem:[#allocation6 + $0xcc] ss:$24 sps:$4 sm:$0xff]  }
  0x2c   :  { %650 = vmatpush1.bf16.msra.mxu0 %v999_v6  ;;  %v1013_v16 = vld [vmem:[#allocation6 + $0xc4] ss:$24 sps:$4 sm:$0xff]   ;;  %v1017_v18 = vld [vmem:[#allocation6 + $0xc0] ss:$24 sps:$4 sm:$0xff]   ;;  %v1019_v20 = vld [vmem:[#allocation6 + $0xf4] ss:$24 sps:$4 sm:$0xff]  }
  0x2d   :  { %691 = vmatpush1.bf16.msra.mxu1 %v1000_v7  ;;  %651 = vmatprep.subr.bf16.mxu0 %v1001_v8  ;;  %v1018_v19 = vld [vmem:[#allocation6 + $0xc8] ss:$24 sps:$4 sm:$0xff]   ;;  %v1021_v21 = vld [vmem:[#allocation6 + $0xfc] ss:$24 sps:$4 sm:$0xff]   ;;  %v1024_v23 = vld [vmem:[#allocation6 + $0xf8] ss:$24 sps:$4 sm:$0xff]   ;;  %v60_v7 = vlaneseq }
  0x2e   :  { %692 = vmatprep.subr.bf16.mxu1 %v1003_v9  ;;  %v1023_v22 = vld [vmem:[#allocation6 + $0xf0] ss:$24 sps:$4 sm:$0xff]   ;;  %v1025_v24 = vld [vmem:[#allocation6 + $0x124] ss:$24 sps:$4 sm:$0xff]   ;;  %v1029_v26 = vld [vmem:[#allocation6 + $0x120] ss:$24 sps:$4 sm:$0xff]  }
  0x2f   :  { %v1027_v25 = vld [vmem:[#allocation6 + $0x12c] ss:$24 sps:$4 sm:$0xff]   ;;  %v1030_v27 = vld [vmem:[#allocation6 + $0x128] ss:$24 sps:$4 sm:$0xff]   ;;  %v1033_v29 = vld [vmem:[#allocation6 + $0x15c] ss:$24 sps:$4 sm:$0xff]  }
  0x30   :  { %652 = vmatpush1.bf16.msra.mxu0 %v1005_v10  ;;  %v1031_v28 = vld [vmem:[#allocation6 + $0x154] ss:$24 sps:$4 sm:$0xff]   ;;  %v1035_v30 = vld [vmem:[#allocation6 + $0x150] ss:$24 sps:$4 sm:$0xff]   ;;  %v1037_v32 = vld [vmem:[#allocation6 + $0x184] ss:$24 sps:$4 sm:$0xff]  }
  0x31   :  { %693 = vmatpush1.bf16.msra.mxu1 %v1006_v11  ;;  %653 = vmatprep.subr.bf16.mxu0 %v1007_v12  ;;  %v1036_v31 = vld [vmem:[#allocation6 + $0x158] ss:$24 sps:$4 sm:$0xff]   ;;  %v1039_v33 = vld [vmem:[#allocation6 + $0x18c] ss:$24 sps:$4 sm:$0xff]   ;;  %v1042_v35 = vld [vmem:[#allocation6 + $0x188] ss:$24 sps:$4 sm:$0xff]  }
  0x32   :  { %694 = vmatprep.subr.bf16.mxu1 %v1009_v13  ;;  %v1041_v34 = vld [vmem:[#allocation6 + $0x180] ss:$24 sps:$4 sm:$0xff]   ;;  %v1043_v36 = vld [vmem:[#allocation6 + $0x1b4] ss:$24 sps:$4 sm:$0xff]   ;;  %v1047_v38 = vld [vmem:[#allocation6 + $0x1b0] ss:$24 sps:$4 sm:$0xff]  }
  0x33   :  { %v1045_v37 = vld [vmem:[#allocation6 + $0x1bc] ss:$24 sps:$4 sm:$0xff]   ;;  %v1048_v39 = vld [vmem:[#allocation6 + $0x1b8] ss:$24 sps:$4 sm:$0xff]   ;;  %v1051_v41 = vld [vmem:[#allocation6 + $0x1ec] ss:$24 sps:$4 sm:$0xff]  }
  0x34   :  { %654 = vmatpush1.bf16.msra.mxu0 %v1011_v14  ;;  %v1049_v40 = vld [vmem:[#allocation6 + $0x1e4] ss:$24 sps:$4 sm:$0xff]   ;;  %v1053_v42 = vld [vmem:[#allocation6 + $0x1e0] ss:$24 sps:$4 sm:$0xff]   ;;  %v1055_v44 = vld [vmem:[#allocation6 + $0x214] ss:$24 sps:$4 sm:$0xff]  }
  0x35   :  { %695 = vmatpush1.bf16.msra.mxu1 %v1012_v15  ;;  %655 = vmatprep.subr.bf16.mxu0 %v1013_v16  ;;  %v1054_v43 = vld [vmem:[#allocation6 + $0x1e8] ss:$24 sps:$4 sm:$0xff]   ;;  %v1057_v45 = vld [vmem:[#allocation6 + $0x21c] ss:$24 sps:$4 sm:$0xff]   ;;  %v1060_v49 = vld [vmem:[#allocation6 + $0x218] ss:$24 sps:$4 sm:$0xff]  }
  0x36   :  { %696 = vmatprep.subr.bf16.mxu1 %v1015_v17  ;;  %v47_v46 = vld [vmem:[#allocation3] sm:$0x3]  ;;  %v1059_v47 = vld [vmem:[#allocation6 + $0x210] ss:$24 sps:$4 sm:$0xff]   ;;  %v1063_v51 = vld [vmem:[#allocation6 + $0x24c] ss:$24 sps:$4 sm:$0xff]  }
  0x37   :  { %v48_v48 = vunpack.c.l.bf16 %v47_v46  ;;  %v1061_v50 = vld [vmem:[#allocation6 + $0x244] ss:$24 sps:$4 sm:$0xff]   ;;  %v1065_v53 = vld [vmem:[#allocation6 + $0x240] ss:$24 sps:$4 sm:$0xff]   ;;  %v1067_v55 = vld [vmem:[#allocation6 + $0x274] ss:$24 sps:$4 sm:$0xff]  }
  0x38   :  { %656 = vmatpush1.bf16.msra.mxu0 %v1017_v18  ;;  %v1066_v54 = vld [vmem:[#allocation6 + $0x248] ss:$24 sps:$4 sm:$0xff]   ;;  %v1069_v56 = vld [vmem:[#allocation6 + $0x27c] ss:$24 sps:$4 sm:$0xff]   ;;  %v1072_v58 = vld [vmem:[#allocation6 + $0x278] ss:$24 sps:$4 sm:$0xff]  }
  0x39   :  { %697 = vmatpush1.bf16.msra.mxu1 %v1018_v19  ;;  %657 = vmatprep.subr.bf16.mxu0 %v1019_v20  ;;  %v885_v52 = vmul.f32 -1.442695, %v48_v48  ;;  %v1071_v57 = vld [vmem:[#allocation6 + $0x270] ss:$24 sps:$4 sm:$0xff]   ;;  %v1073_v59 = vld [vmem:[#allocation6 + $0x2a4] ss:$24 sps:$4 sm:$0xff]  }
  0x3a   :  { %698 = vmatprep.subr.bf16.mxu1 %v1021_v21  ;;  %v1075_v60 = vld [vmem:[#allocation6 + $0x2ac] ss:$24 sps:$4 sm:$0xff]   ;;  %v1077_v61 = vld [vmem:[#allocation6 + $0x2a0] ss:$24 sps:$4 sm:$0xff]   ;;  %v1081_v1 = vld [vmem:[#allocation6 + $0x2dc] ss:$24 sps:$4 sm:$0xff]  }
  0x3b   :  { %1133 = vpow2.f32 %v885_v52  ;;  %v1078_v62 = vld [vmem:[#allocation6 + $0x2a8] ss:$24 sps:$4 sm:$0xff]   ;;  %v1079_v0 = vld [vmem:[#allocation6 + $0x2d4] ss:$24 sps:$4 sm:$0xff]   ;;  %v1084_v4 = vld [vmem:[#allocation6 + $0x2d8] ss:$24 sps:$4 sm:$0xff]  }
  0x3c   :  { %658 = vmatpush1.bf16.msra.mxu0 %v1023_v22  ;;  %v1083_v3 = vld [vmem:[#allocation6 + $0x2d0] ss:$24 sps:$4 sm:$0xff]   ;;  %v1213_v5 = vmov 1983009808   ;;  %v1087_v8 = vld [vmem:[#allocation6 + $0x14] ss:$24 sps:$4 sm:$0xff]  }
  0x3d   :  { %699 = vmatpush1.bf16.msra.mxu1 %v1024_v23  ;;  %659 = vmatprep.subr.bf16.mxu0 %v1025_v24  ;;  %v58_v6 = vunpack.c.l.s4 %v1213_v5  ;;  %v1267_v10 = vshrl.u32 %v60_v7, 7  ;;  %v1085_v18 = vld [vmem:[#allocation6 + $0x10] ss:$24 sps:$4 sm:$0xff]   ;;  %v1090_v19 = vld [vmem:[#allocation6 + $0x44] ss:$24 sps:$4 sm:$0xff]  }
  0x3e   :  { %700 = vmatprep.subr.bf16.mxu1 %v1027_v25  ;;  %v1088_v20 = vld [vmem:[#allocation6 + $0x40] ss:$24 sps:$4 sm:$0xff]   ;;  %v1093_v21 = vld [vmem:[#allocation6 + $0x74] ss:$24 sps:$4 sm:$0xff]   ;;  %v1091_v22 = vld [vmem:[#allocation6 + $0x70] ss:$24 sps:$4 sm:$0xff]  }
  0x3f   :  { %v59_v9 = vunpack.c.0.s8 %v58_v6  ;;  %v1096_v23 = vld [vmem:[#allocation6 + $0xa4] ss:$24 sps:$4 sm:$0xff]   ;;  %v1094_v24 = vld [vmem:[#allocation6 + $0xa0] ss:$24 sps:$4 sm:$0xff]   ;;  %v1099_v25 = vld [vmem:[#allocation6 + $0xd4] ss:$24 sps:$4 sm:$0xff]  }
  0x40   :  { %660 = vmatpush1.bf16.msra.mxu0 %v1029_v26  ;;  %v1097_v26 = vld [vmem:[#allocation6 + $0xd0] ss:$24 sps:$4 sm:$0xff]   ;;  %v824_v52 = vsub.s32 2, %v1267_v10 }
  0x41   :  { %701 = vmatpush1.bf16.msra.mxu1 %v1030_v27  ;;  %661 = vmatprep.subr.bf16.mxu0 %v1031_v28  ;;  %v1270_v11 = vsub.s32 %v59_v9, %v1267_v10  ;;  %v1102_v27 = vld [vmem:[#allocation6 + $0x104] ss:$24 sps:$4 sm:$0xff]   ;;  %v1100_v28 = vld [vmem:[#allocation6 + $0x100] ss:$24 sps:$4 sm:$0xff]   ;;  %v1127_v46 = vld [vmem:[#allocation6 + $0x2b0] ss:$24 sps:$4 sm:$0xff]  }
  0x42   :  { %702 = vmatprep.subr.bf16.mxu1 %v1033_v29  ;;  %v1105_v29 = vld [vmem:[#allocation6 + $0x134] ss:$24 sps:$4 sm:$0xff]  }
  0x44   :  { %662 = vmatpush1.bf16.msra.mxu0 %v1035_v30  ;;  %v1103_v30 = vld [vmem:[#allocation6 + $0x130] ss:$24 sps:$4 sm:$0xff]  }
  0x45   :  { %703 = vmatpush1.bf16.msra.mxu1 %v1036_v31  ;;  %663 = vmatprep.subr.bf16.mxu0 %v1037_v32  ;;  %v1134_v63 = vpop.eup %1133  ;;  %v1108_v31 = vld [vmem:[#allocation6 + $0x164] ss:$24 sps:$4 sm:$0xff]   ;;  %v1106_v32 = vld [vmem:[#allocation6 + $0x160] ss:$24 sps:$4 sm:$0xff]  }
  0x46   :  { %704 = vmatprep.subr.bf16.mxu1 %v1039_v33  ;;  %v52_v2 = vadd.f32 1.0, %v1134_v63  ;;  %v1111_v33 = vld [vmem:[#allocation6 + $0x194] ss:$24 sps:$4 sm:$0xff]  }
  0x48   :  { %664 = vmatpush1.bf16.msra.mxu0 %v1041_v34  ;;  %1135 = vrcp.f32 %v52_v2  ;;  %v1109_v34 = vld [vmem:[#allocation6 + $0x190] ss:$24 sps:$4 sm:$0xff]  }
  0x49   :  { %705 = vmatpush1.bf16.msra.mxu1 %v1042_v35  ;;  %665 = vmatprep.subr.bf16.mxu0 %v1043_v36  ;;  %v1114_v35 = vld [vmem:[#allocation6 + $0x1c4] ss:$24 sps:$4 sm:$0xff]   ;;  %v1112_v36 = vld [vmem:[#allocation6 + $0x1c0] ss:$24 sps:$4 sm:$0xff]  }
  0x4a   :  { %706 = vmatprep.subr.bf16.mxu1 %v1045_v37  ;;  %v1117_v37 = vld [vmem:[#allocation6 + $0x1f4] ss:$24 sps:$4 sm:$0xff]  }
  0x4c   :  { %666 = vmatpush1.bf16.msra.mxu0 %v1047_v38  ;;  %v1115_v38 = vld [vmem:[#allocation6 + $0x1f0] ss:$24 sps:$4 sm:$0xff]  }
  0x4d   :  { %707 = vmatpush1.bf16.msra.mxu1 %v1048_v39  ;;  %667 = vmatprep.subr.bf16.mxu0 %v1049_v40  ;;  %v1120_v39 = vld [vmem:[#allocation6 + $0x224] ss:$24 sps:$4 sm:$0xff]   ;;  %v1118_v40 = vld [vmem:[#allocation6 + $0x220] ss:$24 sps:$4 sm:$0xff]  }
  0x4e   :  { %708 = vmatprep.subr.bf16.mxu1 %v1051_v41  ;;  %v1123_v41 = vld [vmem:[#allocation6 + $0x254] ss:$24 sps:$4 sm:$0xff]  }
  0x50   :  { %668 = vmatpush1.bf16.msra.mxu0 %v1053_v42  ;;  %v1121_v42 = vld [vmem:[#allocation6 + $0x250] ss:$24 sps:$4 sm:$0xff]  }
  0x51   :  { %709 = vmatpush1.bf16.msra.mxu1 %v1054_v43  ;;  %669 = vmatprep.subr.bf16.mxu0 %v1055_v44  ;;  %v1126_v43 = vld [vmem:[#allocation6 + $0x284] ss:$24 sps:$4 sm:$0xff]   ;;  %v1124_v44 = vld [vmem:[#allocation6 + $0x280] ss:$24 sps:$4 sm:$0xff]  }
  0x52   :  { %710 = vmatprep.subr.bf16.mxu1 %v1057_v45  ;;  %v1136_v12 = vpop.eup %1135  ;;  %v1129_v45 = vld [vmem:[#allocation6 + $0x2b4] ss:$24 sps:$4 sm:$0xff]  }
  0x53   :  { %v55_v13 = vmul.f32 %v1136_v12, %v48_v48  ;;  %v1130_v48 = vld [vmem:[#allocation6 + $0x2e0] ss:$24 sps:$4 sm:$0xff]  }
  0x54   :  { %670 = vmatpush1.bf16.msra.mxu0 %v1059_v47  ;;  %v1132_v47 = vld [vmem:[#allocation6 + $0x2e4] ss:$24 sps:$4 sm:$0xff]  }
  0x55   :  { %711 = vmatpush1.bf16.msra.mxu1 %v1060_v49  ;;  %671 = vmatprep.subr.bf16.mxu0 %v1061_v50  ;;  %v63_v14 = vrot.slane %v55_v13, %v1270_v11  ;;  %v1214_v49 = vmov 0.0   ;;  %v816_v50 = vsub.s32 0, %v1267_v10 }
  0x56   :  { %712 = vmatprep.subr.bf16.mxu1 %v1063_v51  ;;  %46 = vst [vmem:[#allocation2 + $0x8] sm:$0xf] %v1214_v49  ;;  %v820_v51 = vsub.s32 1, %v1267_v10 }
  0x57   :  { %v64_v15 = vcombine.high %v63_v14, %v63_v14  ;;  %v1273_v16 = vpack.c.bf16 %v63_v14, %v63_v14 }
  0x58   :  { %672 = vmatpush1.bf16.msra.mxu0 %v1065_v53  ;;  %v828_v53 = vsub.s32 3, %v1267_v10 }
  0x59   :  { %713 = vmatpush1.bf16.msra.mxu1 %v1066_v54  ;;  %673 = vmatprep.subr.bf16.mxu0 %v1067_v55  ;;  %v68_v17 = vpack.c.bf16 %v64_v15, %v64_v15  ;;  %v812_v54 = vld [vmem:[%s1307_s2] sm:$0x3f]  ;;  %s1215_s2 = smov [#allocation8]  }
  0x5a   :  { %714 = vmatprep.subr.bf16.mxu1 %v1069_v56  ;;  %v817_v55 = vrot.slane %v812_v54, %v816_v50  ;;  %v821_v56 = vrot.slane %v812_v54, %v820_v51  ;;  %s875_s11 = sshll.u32 %s1215_s2, 4  ;;  %s876_s11 = int_to_ptr.vmem [resolvable:$true] %s875_s11 }
  0x5b   :  { %679 = vmatprep.mubr.bf16.mxu0 %v68_v17  ;;  %720 = vmatprep.mubr.bf16.mxu1 %v68_v17  ;;  %s1181_s12 = scalar_lea.vmem %s876_s11, 192  ;;  %p1186_p3 = scmp.lt.s32.totalorder %s876_s11, %s876_s11 }
  0x5c   :  { %674 = vmatpush1.bf16.msra.mxu0 %v1071_v57  ;;  %v825_v57 = vrot.slane %v812_v54, %v824_v52  ;;  %p1182_p2 = scmp.ne.s32.totalorder %s876_s11, %s1181_s12  ;;  %p1187_p4 = scmp.lt.s32.totalorder %s1181_s12, %s1181_s12 }
  0x5d   :  { %715 = vmatpush1.bf16.msra.mxu1 %v1072_v58  ;;  %675 = vmatprep.subr.bf16.mxu0 %v1073_v59  ;;  %v829_v58 = vrot.slane %v812_v54, %v828_v53  ;;  %v838_v59 = vcombine.low %v817_v55, %v821_v56 }
  0x5e   :  { %716 = vmatprep.subr.bf16.mxu1 %v1075_v60  ;;  %p1188_p5 = por %p1187_p4, %p1186_p3 }
  0x5f   :  { %v839_v60 = vcombine.low %v825_v57, %v829_v58  ;;  %v846_v5 = vrot.slane %v838_v59, %v1270_v11 }
  0x60   :  { %676 = vmatpush1.bf16.msra.mxu0 %v1077_v61  ;;  %p1189_p6 = pnand %p1188_p5, %p1182_p2 }
  0x61   :  { %717 = vmatpush1.bf16.msra.mxu1 %v1078_v62  ;;  %677 = vmatprep.subr.bf16.mxu0 %v1079_v0  ;;  %v853_v6 = vrot.slane %v839_v60, %v1270_v11 }
  0x62   :  { %718 = vmatprep.subr.bf16.mxu1 %v1081_v1 }
  0x63   :  { %v854_v14 = vcombine.low %v846_v5, %v853_v6 }
  0x64   :  { %678 = vmatpush1.bf16.msra.mxu0 %v1083_v3 }
  0x65   :  { %719 = vmatpush1.bf16.msra.mxu1 %v1084_v4  ;;  %729 = vmatprep.subr.bf16.mxu0 %v1087_v8 }
  0x67   :  { %680 = vmatmul.mubr.bf16.vlgmr.msra.gmra.mrb[0].mxu0 %v1273_v16 }
  0x68   :  { %721 = vmatmul.mubr.bf16.vlgmr.msra.gmra.mrb[0].mxu1 %v1273_v16  ;;  %730 = vmatpush1.bf16.msra.mxu0 %v1085_v18  ;;  %v836_v18 = vsub.s32 5, %v1267_v10 }
  0x69   :  { %761 = vmatprep.mubr.bf16.mxu0 %v68_v17  ;;  %731 = vmatprep.subr.bf16.mxu0 %v1090_v19  ;;  %v832_v17 = vsub.s32 4, %v1267_v10 }
  0x6c   :  { %732 = vmatpush1.bf16.msra.mxu0 %v1088_v20 }
  0x6d   :  { %733 = vmatprep.subr.bf16.mxu0 %v1093_v21 }
  0x70   :  { %734 = vmatpush1.bf16.msra.mxu0 %v1091_v22  ;;  %v70_v22 = vld [vmem:[#allocation2 + $0x8] sm:$0xf] }
  0x71   :  { %735 = vmatprep.subr.bf16.mxu0 %v1096_v23 }
  0x74   :  { %736 = vmatpush1.bf16.msra.mxu0 %v1094_v24 }
  0x75   :  { %737 = vmatprep.subr.bf16.mxu0 %v1099_v25  ;;  %v833_v25 = vrot.slane %v812_v54, %v832_v17 }
  0x78   :  { %738 = vmatpush1.bf16.msra.mxu0 %v1097_v26  ;;  %v837_v26 = vrot.slane %v812_v54, %v836_v18 }
  0x79   :  { %739 = vmatprep.subr.bf16.mxu0 %v1102_v27 }
  0x7c   :  { %740 = vmatpush1.bf16.msra.mxu0 %v1100_v28  ;;  %v855_v28 = vcombine.low %v833_v25, %v837_v26 }
  0x7d   :  { %741 = vmatprep.subr.bf16.mxu0 %v1105_v29 }
  0x7e   :  { %v862_v29 = vrot.slane %v855_v28, %v1270_v11 }
  0x80   :  { %742 = vmatpush1.bf16.msra.mxu0 %v1103_v30 }
  0x81   :  { %743 = vmatprep.subr.bf16.mxu0 %v1108_v31 }
  0x84   :  { %744 = vmatpush1.bf16.msra.mxu0 %v1106_v32 }
  0x85   :  { %745 = vmatprep.subr.bf16.mxu0 %v1111_v33 }
  0x88   :  { %746 = vmatpush1.bf16.msra.mxu0 %v1109_v34 }
  0x89   :  { %747 = vmatprep.subr.bf16.mxu0 %v1114_v35 }
  0x8c   :  { %748 = vmatpush1.bf16.msra.mxu0 %v1112_v36 }
  0x8d   :  { %749 = vmatprep.subr.bf16.mxu0 %v1117_v37 }
  0x90   :  { %750 = vmatpush1.bf16.msra.mxu0 %v1115_v38 }
  0x91   :  { %751 = vmatprep.subr.bf16.mxu0 %v1120_v39 }
  0x94   :  { %752 = vmatpush1.bf16.msra.mxu0 %v1118_v40 }
  0x95   :  { %753 = vmatprep.subr.bf16.mxu0 %v1123_v41 }
  0x98   :  { %754 = vmatpush1.bf16.msra.mxu0 %v1121_v42 }
  0x99   :  { %755 = vmatprep.subr.bf16.mxu0 %v1126_v43 }
  0x9c   :  { %756 = vmatpush1.bf16.msra.mxu0 %v1124_v44 }
  0x9d   :  { %757 = vmatprep.subr.bf16.mxu0 %v1129_v45 }
  0xa0   :  { %758 = vmatpush1.bf16.msra.mxu0 %v1127_v46 }
  0xa1   :  { %759 = vmatprep.subr.bf16.mxu0 %v1132_v47 }
  0xa4   :  { %760 = vmatpush1.bf16.msra.mxu0 %v1130_v48 }
  0xa7   :  { %762 = vmatmul.mubr.bf16.vlgmr.msra.gmra.mrb[4].mxu0 %v1273_v16 }
 0x13a   :  { %v681_v61 = vpop.f32.mrb[0].mxu0 }
 0x13b   :  { %v722_v62 = vpop.f32.mrb[0].mxu1  ;;  %v683_v63 = vpop.f32.mrb[1].mxu0 }
 0x13c   :  { %v724_v0 = vpop.f32.mrb[1].mxu1  ;;  %v776_v1 = vcombine.low %v681_v61, %v683_v63  ;;  %v685_v3 = vpop.f32.mrb[2].mxu0 }
 0x13d   :  { %v777_v2 = vcombine.low %v722_v62, %v724_v0  ;;  %v726_v4 = vpop.f32.mrb[2].mxu1  ;;  %v686_v7 = vpop.f32.mrb[3].mxu0 }
 0x13e   :  { %v727_v8 = vpop.f32.mrb[3].mxu1  ;;  %v784_v9 = vrot.slane %v776_v1, %v1270_v11 }
 0x13f   :  { %v791_v12 = vrot.slane %v777_v2, %v1270_v11 }
 0x141   :  { %v792_v13 = vcombine.low %v784_v9, %v791_v12 }
 0x143   :  { %v865_v15 = vadd.f32 %v854_v14, %v792_v13 }
 0x145   :  { %867 = vst [vmem:[#allocation8] sm:$0xff] %v865_v15 }
 0x17a   :  { %v763_v16 = vpop.f32.mrb[4].mxu0 }
 0x17b   :  { %v765_v19 = vpop.f32.mrb[5].mxu0 }
 0x17c   :  { %v793_v20 = vcombine.low %v763_v16, %v765_v19  ;;  %v767_v21 = vpop.f32.mrb[6].mxu0 }
 0x17d   :  { %v768_v23 = vpop.f32.mrb[7].mxu0 }
 0x17e   :  { %v800_v24 = vrot.slane %v793_v20, %v1270_v11 }
 0x180   :  { %v804_v27 = vadd.f32 %v800_v24, %v70_v22 }
 0x182   :  { %806 = vst [vmem:[#allocation2 + $0x8] sm:$0xf] %v804_v27 }
 0x189   :  { %v811_v30 = vld [vmem:[#allocation2 + $0x8] sm:$0xf] }
 0x18a   :  { %v866_v31 = vadd.f32 %v862_v29, %v811_v30 }
 0x18c   :  { %868 = vst [vmem:[#allocation8 + $0x8] sm:$0xf] %v866_v31 }
 0x18d   :  { %1192 = shalt.err (!%p1189_p6)
}
 0x18e   :  { %s1193_s15 = scalar_lea.hbm %s1308_s3, 192 }
 0x18f   :  { %p1194_p7 = scmp.ne.s32.totalorder %s1308_s3, %s1193_s15  ;;  %p1197_p8 = scmp.lt.u32.totalorder %s1193_s15, %s1308_s3 }
 0x191   :  { %p1199_p9 = pnand %p1197_p8, %p1194_p7 }
 0x193   :  { %1202 = shalt.err (!%p1199_p9)
}
 0x194   :  { %878 = dma.vmem_to_hbm [thread:$0]  %s876_s11, 192, %s1308_s3, [#allocation5]  }
 0x195   :  { %1207 = dma.done.wait [#allocation5], 192  }
 0x196   :  { %1208 = vsyncadd [#allocation5], 4294967104 }
 0x197   :  { %882 = vsyncpa [#allocation4], 1 }
 0x198   :  { %883 = vsyncpa [#allocation7], 1 }
 0x199   :  { %884 = vsyncpa [#allocation5], 1 }

</bundles_post_ra>
